<compile_context>
chip_gen: v7x
topology: tpu7x:2x2x1
jax: 0.10.0
libtpu: 0.0.40
codegen_flags: <defaults>
</compile_context>

<pallas_src>
import jax
import jax.numpy as jnp
from jax.experimental import pallas as pl
from jax.experimental.pallas import tpu as pltpu


def _ffn_body(x_ref, w1_ref, b1_ref, w2_ref, b2_ref, o_ref, acc_ref, h_ref):
    j = pl.program_id(1)
    k = pl.program_id(2)

    @pl.when(k == 0)
    def _init():
        acc_ref[...] = jnp.zeros_like(acc_ref)

    if h_ref is None:
        # Single output tile per batch tile: compute fc1 slice directly.
        x = x_ref[...].astype(w1_ref.dtype)
        h = jnp.dot(x, w1_ref[...], preferred_element_type=jnp.float32)
        h = jnp.maximum(h + b1_ref[...].astype(jnp.float32), 0.0)
        acc_ref[...] += jnp.dot(h.astype(w2_ref.dtype), w2_ref[...],
                                preferred_element_type=jnp.float32)
    else:
        # Multiple output tiles: compute fc1 once per (batch tile, hidden tile)
        # on the first output tile, cache it in VMEM, reuse for the rest.
        @pl.when(j == 0)
        def _fc1():
            x = x_ref[...].astype(w1_ref.dtype)
            h = jnp.dot(x, w1_ref[...], preferred_element_type=jnp.float32)
            h = jnp.maximum(h + b1_ref[...].astype(jnp.float32), 0.0)
            h_ref[k] = h.astype(h_ref.dtype)

        acc_ref[...] += jnp.dot(h_ref[k], w2_ref[...],
                                preferred_element_type=jnp.float32)

    @pl.when(k == pl.num_programs(2) - 1)
    def _finalize():
        o_ref[...] = (acc_ref[...] + b2_ref[...].astype(jnp.float32)
                      ).astype(o_ref.dtype)


def _ffn_kernel(x_ref, w1_ref, b1_ref, w2_ref, b2_ref, o_ref, acc_ref):
    _ffn_body(x_ref, w1_ref, b1_ref, w2_ref, b2_ref, o_ref, acc_ref, None)


def _ffn_kernel_cached(x_ref, w1_ref, b1_ref, w2_ref, b2_ref, o_ref,
                       acc_ref, h_ref):
    _ffn_body(x_ref, w1_ref, b1_ref, w2_ref, b2_ref, o_ref, acc_ref, h_ref)


def _choose_tiles(M, input_dim, hidden_dim, output_dim, x_it, w_it):
    """Pick (tile_m, tile_n, tile_h). Tiled lane dims are multiples of 128
    (or the full extent), and the hidden tile always divides hidden_dim."""
    # Hidden tile: prefer full hidden; otherwise largest 128-multiple divisor
    # that keeps the (input_dim, th) w1 block under ~8 MiB per buffer.
    w1_budget = 8 << 20
    th = hidden_dim
    if hidden_dim > 2048 or input_dim * hidden_dim * w_it > w1_budget:
        for c in (2048, 1024, 512, 384, 256, 128):
            if hidden_dim % c == 0 and input_dim * c * w_it <= w1_budget:
                th = c
                break

    # Output tile: full output keeps the grid effectively 2-D (no fc1 reuse
    # machinery needed) and the output lane-dense.
    tn = output_dim
    if output_dim > 2048:
        for c in (2048, 1024, 512, 384, 256, 128):
            if output_dim % c == 0:
                tn = c
                break

    # Batch tile under ~24 MiB working set (fits all generations' scoped VMEM
    # once double-buffering is counted).
    sub = 8 if x_it >= 4 else 16
    cache = tn < output_dim
    num_k = -(-hidden_dim // th)
    fixed = w_it * (2 * input_dim * th + 2 * th * tn + 2 * (th + tn))
    per_row = (2 * input_dim * x_it      # x block, double-buffered
               + 2 * tn * x_it           # out block, double-buffered
               + 4 * tn                  # f32 accumulator
               + 4 * th)                 # f32 fc1 intermediate
    if cache:
        per_row += num_k * th * w_it     # cached fc1 activations
    budget = 24 << 20
    tm = max((budget - fixed) // per_row, sub)
    tm = min(tm, M, 1024)
    if tm < M:
        tm = max(sub, (tm // sub) * sub)
    else:
        tm = M
    return int(tm), int(tn), int(th)


def ffn_pallas(x, w1, b1, w2, b2, *, tile_m=None, tile_n=None, tile_h=None):
    M, input_dim = x.shape
    hidden_dim, output_dim = w2.shape
    assert w1.shape == (input_dim, hidden_dim)
    b1 = b1.reshape(1, hidden_dim)
    b2 = b2.reshape(1, output_dim)

    x_it = jnp.dtype(x.dtype).itemsize
    w_it = jnp.dtype(w1.dtype).itemsize

    tm, tn, th = _choose_tiles(M, input_dim, hidden_dim, output_dim, x_it, w_it)
    if tile_m is not None:
        tm = int(tile_m)
    if tile_n is not None:
        tn = int(tile_n)
    if tile_h is not None:
        th = int(tile_h)
    tm, tn, th = min(tm, M), min(tn, output_dim), min(th, hidden_dim)

    # Hidden axis is the fc2 reduction: its tile must divide hidden_dim so
    # boundary-block padding never reaches the accumulator.
    assert hidden_dim % th == 0, "tile_h must divide hidden_dim"

    num_i = -(-M // tm)
    num_j = -(-output_dim // tn)
    num_k = hidden_dim // th
    grid = (num_i, num_j, num_k)
    cache_fc1 = num_j > 1

    scratch = [pltpu.VMEM((tm, tn), jnp.float32)]
    kernel = _ffn_kernel
    if cache_fc1:
        scratch.append(pltpu.VMEM((num_k, tm, th), w2.dtype))
        kernel = _ffn_kernel_cached

    block_bytes = (2 * tm * input_dim * x_it
                   + 2 * input_dim * th * w_it
                   + 2 * th * tn * w_it
                   + 2 * (th + tn) * w_it
                   + 2 * tm * tn * x_it
                   + tm * tn * 4
                   + tm * th * 4
                   + (num_k * tm * th * w_it if cache_fc1 else 0))
    vmem_limit = int(min(max(block_bytes * 3 // 2, 32 << 20), 48 << 20))

    cost = pl.CostEstimate(
        flops=2 * M * (input_dim * hidden_dim + hidden_dim * output_dim),
        transcendentals=0,
        bytes_accessed=int(x.size * x_it
                           + (w1.size + b1.size + w2.size + b2.size) * w_it
                           + M * output_dim * x_it))

    # With the fc1 cache the first output tile must run before the others for
    # a given batch tile, so only the batch axis is megacore-parallel.
    dims = (("parallel", "arbitrary", "arbitrary") if cache_fc1
            else ("parallel", "parallel", "arbitrary"))

    return pl.pallas_call(
        kernel,
        out_shape=jax.ShapeDtypeStruct((M, output_dim), x.dtype),
        grid_spec=pltpu.PrefetchScalarGridSpec(
            num_scalar_prefetch=0,
            grid=grid,
            in_specs=[
                pl.BlockSpec((tm, input_dim), lambda i, j, k: (i, 0)),
                pl.BlockSpec((input_dim, th), lambda i, j, k: (0, k)),
                pl.BlockSpec((1, th), lambda i, j, k: (0, k)),
                pl.BlockSpec((th, tn), lambda i, j, k: (k, j)),
                pl.BlockSpec((1, tn), lambda i, j, k: (0, j)),
            ],
            out_specs=pl.BlockSpec((tm, tn), lambda i, j, k: (i, j)),
            scratch_shapes=scratch,
        ),
        compiler_params=pltpu.CompilerParams(
            dimension_semantics=dims,
            vmem_limit_bytes=vmem_limit),
        cost_estimate=cost,
    )(x, w1, b1, w2, b2)


def init_params(key, input_dim, hidden_dim, output_dim, dtype=jnp.float32):
    # Deterministic init mirroring nn.Linear's U(-1/sqrt(fan_in), 1/sqrt(fan_in))
    k1, k2, k3, k4 = jax.random.split(key, 4)
    bound1 = 1.0 / (input_dim ** 0.5)
    bound2 = 1.0 / (hidden_dim ** 0.5)
    w1 = jax.random.uniform(k1, (input_dim, hidden_dim), dtype, -bound1, bound1)
    b1 = jax.random.uniform(k2, (1, hidden_dim), dtype, -bound1, bound1)
    w2 = jax.random.uniform(k3, (hidden_dim, output_dim), dtype, -bound2, bound2)
    b2 = jax.random.uniform(k4, (1, output_dim), dtype, -bound2, bound2)
    return w1, b1, w2, b2


if __name__ == "__main__":
    key = jax.random.PRNGKey(0)
    kx, kp, kx2, kp2 = jax.random.split(key, 4)

    # Small demo shapes (each full array is one block; grid == (1, 1, 1)).
    batch, d_in, d_hid, d_out = 8, 16, 32, 16
    x = jax.random.normal(kx, (batch, d_in), jnp.float32)
    w1, b1, w2, b2 = init_params(kp, d_in, d_hid, d_out)
    out = jax.block_until_ready(ffn_pallas(x, w1, b1, w2, b2))
    ref = jnp.maximum(x @ w1 + b1, 0.0) @ w2 + b2
    assert out.shape == (batch, d_out)
    assert jnp.allclose(out, ref, atol=1e-5, rtol=1e-5)

    # Larger shape exercising the full 3-axis tiling: multi-step hidden
    # reduction (pl.when init/finalize accumulator) and two output tiles
    # (fc1 VMEM-cache reuse path), with forced 128-aligned tiles.
    B2, D_IN, D_HID, D_OUT = 256, 128, 512, 256
    x2 = jax.random.normal(kx2, (B2, D_IN), jnp.float32)
    p2 = init_params(kp2, D_IN, D_HID, D_OUT)
    out2 = jax.block_until_ready(
        ffn_pallas(x2, *p2, tile_m=128, tile_n=128, tile_h=128))
    ref2 = jnp.maximum(x2 @ p2[0] + p2[1], 0.0) @ p2[2] + p2[3]
    assert out2.shape == (B2, D_OUT)
    assert jnp.allclose(out2, ref2, atol=2e-2, rtol=2e-2)

    print("KERNEL_OK")
</pallas_src>

<mosaic_0001>
module attributes {stable_mosaic.version = 11 : i64} {
  func.func @_ffn_kernel(%arg0: i32, %arg1: i32, %arg2: i32, %arg3: memref<8x16xf32, #tpu.memory_space<vmem>>, %arg4: memref<16x32xf32, #tpu.memory_space<vmem>>, %arg5: memref<1x32xf32, #tpu.memory_space<vmem>>, %arg6: memref<32x16xf32, #tpu.memory_space<vmem>>, %arg7: memref<1x16xf32, #tpu.memory_space<vmem>>, %arg8: memref<8x16xf32, #tpu.memory_space<vmem>>, %arg9: memref<8x16xf32, #tpu.memory_space<vmem>>) attributes {dimension_semantics = [#tpu.dimension_semantics<parallel>, #tpu.dimension_semantics<parallel>, #tpu.dimension_semantics<arbitrary>], iteration_bounds = array<i64: 1, 1, 1>, scalar_prefetch = 0 : i64, scratch_operands = 1 : i64, tpu.core_type = #tpu.core_type<tc>, window_params = [{transform_indices = @transform_0, window_bounds = array<i64: 8, 16>}, {transform_indices = @transform_1, window_bounds = array<i64: 16, 32>}, {transform_indices = @transform_2, window_bounds = array<i64: 1, 32>}, {transform_indices = @transform_3, window_bounds = array<i64: 32, 16>}, {transform_indices = @transform_4, window_bounds = array<i64: 1, 16>}, {transform_indices = @transform_5, window_bounds = array<i64: 8, 16>}]} {
    %c0_i32 = arith.constant 0 : i32
    %0 = arith.cmpi eq, %arg2, %c0_i32 : i32
    %1 = arith.extui %0 : i1 to i32
    %c0_i32_0 = arith.constant 0 : i32
    %2 = arith.cmpi ne, %1, %c0_i32_0 : i32
    scf.if %2 {
      %cst_16 = arith.constant 0.000000e+00 : f32
      %19 = vector.broadcast %cst_16 : f32 to vector<8x16xf32>
      %c0_17 = arith.constant 0 : index
      %c0_18 = arith.constant 0 : index
      %20 = vector.load %arg9[%c0_17, %c0_18] : memref<8x16xf32, #tpu.memory_space<vmem>>, vector<8x16xf32>
      tpu.vector_store %arg9[%c0_17, %c0_18], %19 {strides = array<i32>} : memref<8x16xf32, #tpu.memory_space<vmem>>, vector<8x16xf32>,
    } else {
    }
    %c0 = arith.constant 0 : index
    %c0_1 = arith.constant 0 : index
    %3 = vector.load %arg3[%c0, %c0_1] : memref<8x16xf32, #tpu.memory_space<vmem>>, vector<8x16xf32>
    %c0_2 = arith.constant 0 : index
    %c0_3 = arith.constant 0 : index
    %4 = vector.load %arg4[%c0_2, %c0_3] : memref<16x32xf32, #tpu.memory_space<vmem>>, vector<16x32xf32>
    %cst = arith.constant dense<0.000000e+00> : vector<8x32xf32>
    %5 = tpu.matmul %3, %4, %cst {dimension_numbers = #tpu.dot_dimension_numbers<[1], [0], [0], [1], [0, 0, 1, 1], [], []>} : vector<8x16xf32>, vector<16x32xf32>, vector<8x32xf32> -> vector<8x32xf32>
    %c0_4 = arith.constant 0 : index
    %c0_5 = arith.constant 0 : index
    %6 = vector.load %arg5[%c0_4, %c0_5] : memref<1x32xf32, #tpu.memory_space<vmem>>, vector<1x32xf32>
    %7 = vector.broadcast %6 : vector<1x32xf32> to vector<8x32xf32>
    %8 = arith.addf %5, %7 : vector<8x32xf32>
    %cst_6 = arith.constant 0.000000e+00 : f32
    %9 = vector.broadcast %cst_6 : f32 to vector<8x32xf32>
    %10 = arith.maximumf %8, %9 : vector<8x32xf32>
    %c0_7 = arith.constant 0 : index
    %c0_8 = arith.constant 0 : index
    %11 = vector.load %arg9[%c0_7, %c0_8] : memref<8x16xf32, #tpu.memory_space<vmem>>, vector<8x16xf32>
    %c0_9 = arith.constant 0 : index
    %c0_10 = arith.constant 0 : index
    %12 = vector.load %arg6[%c0_9, %c0_10] : memref<32x16xf32, #tpu.memory_space<vmem>>, vector<32x16xf32>
    %cst_11 = arith.constant dense<0.000000e+00> : vector<8x16xf32>
    %13 = tpu.matmul %10, %12, %cst_11 {dimension_numbers = #tpu.dot_dimension_numbers<[1], [0], [0], [1], [0, 0, 1, 1], [], []>} : vector<8x32xf32>, vector<32x16xf32>, vector<8x16xf32> -> vector<8x16xf32>
    %14 = arith.addf %11, %13 : vector<8x16xf32>
    %c0_12 = arith.constant 0 : index
    %c0_13 = arith.constant 0 : index
    %15 = vector.load %arg9[%c0_12, %c0_13] : memref<8x16xf32, #tpu.memory_space<vmem>>, vector<8x16xf32>
    tpu.vector_store %arg9[%c0_12, %c0_13], %14 {strides = array<i32>} : memref<8x16xf32, #tpu.memory_space<vmem>>, vector<8x16xf32>,
    %c0_i32_14 = arith.constant 0 : i32
    %16 = arith.cmpi eq, %arg2, %c0_i32_14 : i32
    %17 = arith.extui %16 : i1 to i32
    %c0_i32_15 = arith.constant 0 : i32
    %18 = arith.cmpi ne, %17, %c0_i32_15 : i32
    scf.if %18 {
      %c0_16 = arith.constant 0 : index
      %c0_17 = arith.constant 0 : index
      %19 = vector.load %arg9[%c0_16, %c0_17] : memref<8x16xf32, #tpu.memory_space<vmem>>, vector<8x16xf32>
      %c0_18 = arith.constant 0 : index
      %c0_19 = arith.constant 0 : index
      %20 = vector.load %arg7[%c0_18, %c0_19] : memref<1x16xf32, #tpu.memory_space<vmem>>, vector<1x16xf32>
      %21 = vector.broadcast %20 : vector<1x16xf32> to vector<8x16xf32>
      %22 = arith.addf %19, %21 : vector<8x16xf32>
      %c0_20 = arith.constant 0 : index
      %c0_21 = arith.constant 0 : index
      %23 = vector.load %arg8[%c0_20, %c0_21] : memref<8x16xf32, #tpu.memory_space<vmem>>, vector<8x16xf32>
      tpu.vector_store %arg8[%c0_20, %c0_21], %22 {strides = array<i32>} : memref<8x16xf32, #tpu.memory_space<vmem>>, vector<8x16xf32>,
    } else {
    }
    return
  }
  func.func @transform_0(%arg0: i32, %arg1: i32, %arg2: i32) -> (i32, i32) {
    %c0_i32 = arith.constant 0 : i32
    %c0_i32_0 = arith.constant 0 : i32
    return %arg0, %c0_i32 : i32, i32
  }
  func.func @transform_1(%arg0: i32, %arg1: i32, %arg2: i32) -> (i32, i32) {
    %c0_i32 = arith.constant 0 : i32
    %c0_i32_0 = arith.constant 0 : i32
    return %c0_i32, %arg2 : i32, i32
  }
  func.func @transform_2(%arg0: i32, %arg1: i32, %arg2: i32) -> (i32, i32) {
    %c0_i32 = arith.constant 0 : i32
    %c0_i32_0 = arith.constant 0 : i32
    return %c0_i32, %arg2 : i32, i32
  }
  func.func @transform_3(%arg0: i32, %arg1: i32, %arg2: i32) -> (i32, i32) {
    %c0_i32 = arith.constant 0 : i32
    return %arg2, %arg1 : i32, i32
  }
  func.func @transform_4(%arg0: i32, %arg1: i32, %arg2: i32) -> (i32, i32) {
    %c0_i32 = arith.constant 0 : i32
    %c0_i32_0 = arith.constant 0 : i32
    return %c0_i32, %arg1 : i32, i32
  }
  func.func @transform_5(%arg0: i32, %arg1: i32, %arg2: i32) -> (i32, i32) {
    %c0_i32 = arith.constant 0 : i32
    return %arg0, %arg1 : i32, i32
  }
}

</mosaic_0001>

<bundles_post_ra>
// kernel: tpu_custom_call.1
= control target key start
LH: loop header
LB: loop body
LE: loop exit
PB: predicated region body
PF: predicated region fallthrough
CT: control target
= control target key end

     0   :  { %vm25_vm0 = vcmask 130048   ;;  %v287_v2 = vmov 0.0|0.0   ;;  %vm288_vm1 = vmmov 0   ;;  %v289_v4 = vmov 0.0   ;;  %s364_s0 = inlined_call_operand.vmem [shape: f32[8,16], index: 0, kind: input, shape index: {}]   ;;  %s365_s1 = inlined_call_operand.vmem [shape: f32[16,32], index: 1, kind: input, shape index: {}]   ;;  %s366_s2 = inlined_call_operand.vmem [shape: f32[1,32], index: 2, kind: input, shape index: {}]   ;;  %s367_s3 = inlined_call_operand.vmem [shape: f32[32,16], index: 3, kind: input, shape index: {}]   ;;  %s368_s4 = inlined_call_operand.vmem [shape: f32[1,16], index: 4, kind: input, shape index: {}]   ;;  %s369_s5 = inlined_call_operand.hbm [shape: f32[8,16], index: 5, kind: output, shape index: {}]  }
   0x1   :  { %v28_v0 = vld [vmem:[%s365_s1] sm:$0xff]  ;;  %v29_v1 = vld [vmem:[%s365_s1 + $0x8] sm:$0xff]  ;;  %250 = vmatprep.subr.bf16.mxu0 %v287_v2  ;;  %236 = vmatprep.mubr.msk.f32.mxu0 %vm288_vm1, %v289_v4  ;;  %26 = vst.msk [vmem:[#allocation2] sm:$0xff] %vm25_vm0, %v289_v4 }
   0x2   :  { %v251_v3 = vpack.c.bf16 %v29_v1, %v28_v0  ;;  %v113_v5 = vld [vmem:[%s367_s3] sm:$0xff]  ;;  %v114_v6 = vld [vmem:[%s367_s3 + $0x8] sm:$0xff]  ;;  %253 = vmatprep.subr.bf16.mxu1 %v287_v2  ;;  %247 = vmatprep.mubr.msk.f32.mxu1 %vm288_vm1, %v289_v4 }
   0x3   :  { %v254_v7 = vpack.c.bf16 %v114_v6, %v113_v5 }
   0x4   :  { %10 = vsyncpa [#allocation4], 0  ;;  %252 = vmatpush3.bf16.msra.mxu0 %v251_v3  ;;  %v27_v8 = vld [vmem:[%s364_s0] sm:$0xff]  ;;  %v115_v9 = vld [vmem:[%s367_s3 + $0x10] sm:$0xff]  ;;  %vm117_vm2 = vcmask 261120   ;;  %s290_s8 = smov [#allocation3]  }
   0x5   :  { %255 = vmatpush3.bf16.msra.mxu1 %v254_v7  ;;  %v116_v10 = vld [vmem:[%s367_s3 + $0x18] sm:$0xff]  ;;  %v220_v12 = vld [vmem:[%s366_s2] ss:$0 sm:$0xff]  ;;  %s212_s9 = sshll.u32 %s290_s8, 4  ;;  %s213_s9 = int_to_ptr.vmem [resolvable:$true] %s212_s9 }
   0x6   :  { %256 = vmatprep.subr.bf16.mxu1 %v287_v2  ;;  %v257_v11 = vpack.c.bf16 %v116_v10, %v115_v9  ;;  %v223_v21 = vld [vmem:[%s368_s4] ss:$0 sm:$0xff]  ;;  %s263_s2 = scalar_lea.vmem %s213_s9, 128  ;;  %p268_p1 = scmp.lt.s32.totalorder %s213_s9, %s213_s9 }
   0x7   :  { %237 = vmatmul.mubr.msk.f32.vlgmr.msra.gmra.mrb[0].mxu0 %vm25_vm0, %v27_v8  ;;  %p264_p0 = scmp.ne.s32.totalorder %s213_s9, %s263_s2  ;;  %p269_p2 = scmp.lt.s32.totalorder %s263_s2, %s263_s2 }
   0x8   :  { %v112_v17 = vld [vmem:[#allocation2] sm:$0xff] }
   0x9   :  { %258 = vmatpush3.bf16.msra.mxu1 %v257_v11  ;;  %p270_p3 = por %p269_p2, %p268_p1 }
   0xb   :  { %p271_p4 = pnand %p270_p3, %p264_p0 }
  0xda   :  { %v107_v13 = vpop.f32.mrb[0].mxu0 }
  0xdb   :  { %v108_v14 = vadd.f32 %v220_v12, %v107_v13  ;;  %v238_v15 = vpop.f32.mrb[1].mxu0 }
  0xdd   :  { %v111_v16 = vmax.f32 %v108_v14, 0.0 }
  0xdf   :  { %248 = vmatmul.mubr.msk.f32.vlgmr.msra.gmra.mrb[0].mxu1 %vm117_vm2, %v111_v16 }
 0x1b2   :  { %v187_v18 = vpop.f32.mrb[0].mxu1 }
 0x1b3   :  { %v191_v19 = vadd.f32 %v187_v18, %v112_v17  ;;  %v249_v20 = vpop.f32.mrb[1].mxu1 }
 0x1b5   :  { %192 = vst.msk [vmem:[#allocation2] sm:$0xff] %vm25_vm0, %v191_v19 }
 0x1bc   :  { %v196_v22 = vld [vmem:[#allocation2] sm:$0xff] }
 0x1bd   :  { %v204_v23 = vadd.f32 %v223_v21, %v196_v22 }
 0x1bf   :  { %205 = vst.msk [vmem:[#allocation3] sm:$0xff] %vm25_vm0, %v204_v23 }
 0x1c0   :  { %274 = shalt.err (!%p271_p4)
}
 0x1c1   :  { %s275_s12 = scalar_lea.hbm %s369_s5, 128 }
 0x1c2   :  { %p276_p5 = scmp.ne.s32.totalorder %s369_s5, %s275_s12  ;;  %p279_p6 = scmp.lt.u32.totalorder %s275_s12, %s369_s5 }
 0x1c4   :  { %p281_p7 = pnand %p279_p6, %p276_p5 }
 0x1c6   :  { %284 = shalt.err (!%p281_p7)
}
 0x1c7   :  { %215 = dma.vmem_to_hbm [thread:$0]  %s213_s9, 128, %s369_s5, [#allocation4]  }
 0x1c8   :  { %285 = dma.done.wait [#allocation4], 128  }
 0x1c9   :  { %286 = vsyncadd [#allocation4], 4294967168 }
 0x1ca   :  { %219 = vsyncpa [#allocation4], 1 }

</bundles_post_ra>
